<compile_context>
chip_gen: v5e
topology: v5e:2x2
jax: 0.10.0
libtpu: 0.0.40
codegen_flags: <defaults>
</compile_context>

<pallas_src>
import jax
import jax.numpy as jnp
from jax.experimental import pallas as pl
from jax.experimental.pallas import tpu as pltpu

KH = KW = 3  # enc_s kernel size (static)


def _enc_plus_conv_kernel(p_ref, w1_ref, b1_ref, w2_ref, b2_ref, o_ref):
    """One batch element per (parallel) grid step.

    p_ref  : (1, KH*KW*Cin, H*W)  im2col patches, channels on sublanes, pixels on lanes
    w1_ref : (Cenc, KH*KW*Cin)    enc_s 3x3 conv weights, flattened (kh,kw,cin)
    b1_ref : (Cenc, 1)            enc_s bias (column)
    w2_ref : (Cout, Cenc)         1x1 conv weights (transposed)
    b2_ref : (Cout, 1)            1x1 conv bias (column)
    o_ref  : (1, Cout, H*W)       output tile (lane-dense, 256-wide)
    """
    patches = p_ref[0]                                      # (36, HW)

    # enc_s: single K=36 MXU matmul + bias + ReLU, all kept in vregs.
    enc = jnp.dot(w1_ref[...], patches,
                  preferred_element_type=jnp.float32) + b1_ref[...]
    enc = jnp.maximum(enc, 0.0)

    # conv: 1x1 conv == per-pixel channel matmul.
    out = jnp.dot(w2_ref[...], enc,
                  preferred_element_type=jnp.float32) + b2_ref[...]
    o_ref[0] = out.astype(o_ref.dtype)


def enc_plus_conv(x_nchw, w1, b1, w2, b2):
    """x_nchw: (N, Cin, H, W); w1: (KH, KW, Cin, Cenc) HWIO; b1: (Cenc,);
    w2: (Cenc, Cout); b2: (Cout,).  Returns (N, Cout, H, W) (NCHW, like torch)."""
    N, Cin, H, W = x_nchw.shape
    Cenc = w1.shape[3]
    Cout = w2.shape[1]
    HW = H * W
    K = KH * KW * Cin

    # Glue (all tiny, fuses in XLA): pad spatially and im2col in NCHW layout,
    # keeping the flattened pixel axis last (lane axis).  No NHWC transpose.
    x = x_nchw.astype(jnp.float32)
    xp = jnp.pad(x, ((0, 0), (0, 0), (1, 1), (1, 1)))        # padding=1 of the 3x3 conv
    patches = jnp.stack(
        [xp[:, :, kh:kh + H, kw:kw + W] for kh in range(KH) for kw in range(KW)],
        axis=1,
    ).reshape(N, K, HW)                                       # (N, 36, H*W), K order (kh,kw,cin)

    w1m = w1.astype(jnp.float32).reshape(K, Cenc).T           # (Cenc, 36), matches patch K order
    w2t = w2.astype(jnp.float32).T                            # (Cout, Cenc)
    b1c = b1.astype(jnp.float32).reshape(Cenc, 1)
    b2c = b2.astype(jnp.float32).reshape(Cout, 1)

    grid_spec = pltpu.PrefetchScalarGridSpec(
        num_scalar_prefetch=0,
        grid=(N,),
        in_specs=[
            pl.BlockSpec((1, K, HW), lambda n: (n, 0, 0)),
            pl.BlockSpec((Cenc, K), lambda n: (0, 0)),
            pl.BlockSpec((Cenc, 1), lambda n: (0, 0)),
            pl.BlockSpec((Cout, Cenc), lambda n: (0, 0)),
            pl.BlockSpec((Cout, 1), lambda n: (0, 0)),
        ],
        out_specs=pl.BlockSpec((1, Cout, HW), lambda n: (n, 0, 0)),
    )

    out = pl.pallas_call(
        _enc_plus_conv_kernel,
        out_shape=jax.ShapeDtypeStruct((N, Cout, HW), jnp.float32),
        grid_spec=grid_spec,
        compiler_params=pltpu.CompilerParams(
            dimension_semantics=("parallel",)
        ),
    )(patches, w1m, b1c, w2t, b2c)

    # Already channel-major: free row-major reshape back to NCHW.
    return out.reshape(N, Cout, H, W)


def _reference(x_nchw, w1, b1, w2, b2):
    """Pure-JAX reference (mirrors torch Conv2d semantics)."""
    x = jnp.transpose(x_nchw, (0, 2, 3, 1)).astype(jnp.float32)  # NHWC
    enc = jax.lax.conv_general_dilated(
        x, w1, window_strides=(1, 1), padding=((1, 1), (1, 1)),
        dimension_numbers=("NHWC", "HWIO", "NHWC"),
    ) + b1
    enc = jnp.maximum(enc, 0.0)
    out = jnp.einsum("nhwc,co->nhwo", enc, w2) + b2
    return jnp.transpose(out, (0, 3, 1, 2))


if __name__ == "__main__":
    key = jax.random.PRNGKey(0)
    k_x, k_w1, k_b1, k_w2, k_b2 = jax.random.split(key, 5)

    N, Cin, H, W = 2, 4, 16, 16
    Cenc, Cout = 8, 8

    x = jax.random.normal(k_x, (N, Cin, H, W), dtype=jnp.float32)

    # Deterministic parameter init (Kaiming-uniform-ish scales, same shapes
    # as torch Conv2d weights, stored HWIO / IO).
    w1 = jax.random.uniform(k_w1, (KH, KW, Cin, Cenc), jnp.float32,
                            minval=-1.0, maxval=1.0) / (KH * KW * Cin) ** 0.5
    b1 = jax.random.uniform(k_b1, (Cenc,), jnp.float32, minval=-0.1, maxval=0.1)
    w2 = jax.random.uniform(k_w2, (Cenc, Cout), jnp.float32,
                            minval=-1.0, maxval=1.0) / Cenc ** 0.5
    b2 = jax.random.uniform(k_b2, (Cout,), jnp.float32, minval=-0.1, maxval=0.1)

    out = enc_plus_conv(x, w1, b1, w2, b2)
    out = jax.block_until_ready(out)

    ref = _reference(x, w1, b1, w2, b2)
    assert out.shape == (N, Cout, H, W), out.shape
    assert jnp.allclose(out, ref, atol=1e-4, rtol=1e-4), "mismatch vs reference"

    print("KERNEL_OK")
</pallas_src>

<mosaic_0001>
module attributes {stable_mosaic.version = 11 : i64} {
  func.func @_enc_plus_conv_kernel(%arg0: i32, %arg1: memref<1x36x256xf32, #tpu.memory_space<vmem>>, %arg2: memref<8x36xf32, #tpu.memory_space<vmem>>, %arg3: memref<8x1xf32, #tpu.memory_space<vmem>>, %arg4: memref<8x8xf32, #tpu.memory_space<vmem>>, %arg5: memref<8x1xf32, #tpu.memory_space<vmem>>, %arg6: memref<1x8x256xf32, #tpu.memory_space<vmem>>) attributes {dimension_semantics = [#tpu.dimension_semantics<parallel>], iteration_bounds = array<i64: 2>, scalar_prefetch = 0 : i64, scratch_operands = 0 : i64, tpu.core_type = #tpu.core_type<tc>, window_params = [{transform_indices = @transform_0, window_bounds = array<i64: 1, 36, 256>}, {pipeline_mode = #tpu.pipeline_mode<synchronous>, transform_indices = @transform_1, window_bounds = array<i64: 8, 36>}, {pipeline_mode = #tpu.pipeline_mode<synchronous>, transform_indices = @transform_2, window_bounds = array<i64: 8, 1>}, {pipeline_mode = #tpu.pipeline_mode<synchronous>, transform_indices = @transform_3, window_bounds = array<i64: 8, 8>}, {pipeline_mode = #tpu.pipeline_mode<synchronous>, transform_indices = @transform_4, window_bounds = array<i64: 8, 1>}, {transform_indices = @transform_5, window_bounds = array<i64: 1, 8, 256>}]} {
    %c0 = arith.constant 0 : index
    %c0_0 = arith.constant 0 : index
    %c0_1 = arith.constant 0 : index
    %0 = vector.load %arg1[%c0, %c0_0, %c0_1] : memref<1x36x256xf32, #tpu.memory_space<vmem>>, vector<1x36x256xf32>
    %1 = vector.shape_cast %0 : vector<1x36x256xf32> to vector<36x256xf32>
    %c0_2 = arith.constant 0 : index
    %c0_3 = arith.constant 0 : index
    %2 = vector.load %arg2[%c0_2, %c0_3] : memref<8x36xf32, #tpu.memory_space<vmem>>, vector<8x36xf32>
    %cst = arith.constant dense<0.000000e+00> : vector<8x256xf32>
    %3 = tpu.matmul %2, %1, %cst {dimension_numbers = #tpu.dot_dimension_numbers<[1], [0], [0], [1], [0, 0, 1, 1], [], []>} : vector<8x36xf32>, vector<36x256xf32>, vector<8x256xf32> -> vector<8x256xf32>
    %c0_4 = arith.constant 0 : index
    %c0_5 = arith.constant 0 : index
    %4 = vector.load %arg3[%c0_4, %c0_5] : memref<8x1xf32, #tpu.memory_space<vmem>>, vector<8x1xf32>
    %5 = vector.broadcast %4 : vector<8x1xf32> to vector<8x256xf32>
    %6 = arith.addf %3, %5 : vector<8x256xf32>
    %cst_6 = arith.constant 0.000000e+00 : f32
    %7 = vector.broadcast %cst_6 : f32 to vector<8x256xf32>
    %8 = arith.maximumf %6, %7 : vector<8x256xf32>
    %c0_7 = arith.constant 0 : index
    %c0_8 = arith.constant 0 : index
    %9 = vector.load %arg4[%c0_7, %c0_8] : memref<8x8xf32, #tpu.memory_space<vmem>>, vector<8x8xf32>
    %cst_9 = arith.constant dense<0.000000e+00> : vector<8x256xf32>
    %10 = tpu.matmul %9, %8, %cst_9 {dimension_numbers = #tpu.dot_dimension_numbers<[1], [0], [0], [1], [0, 0, 1, 1], [], []>} : vector<8x8xf32>, vector<8x256xf32>, vector<8x256xf32> -> vector<8x256xf32>
    %c0_10 = arith.constant 0 : index
    %c0_11 = arith.constant 0 : index
    %11 = vector.load %arg5[%c0_10, %c0_11] : memref<8x1xf32, #tpu.memory_space<vmem>>, vector<8x1xf32>
    %12 = vector.broadcast %11 : vector<8x1xf32> to vector<8x256xf32>
    %13 = arith.addf %10, %12 : vector<8x256xf32>
    %c0_12 = arith.constant 0 : index
    %c0_13 = arith.constant 0 : index
    %c0_14 = arith.constant 0 : index
    %14 = vector.load %arg6[%c0_12, %c0_13, %c0_14] : memref<1x8x256xf32, #tpu.memory_space<vmem>>, vector<1x8x256xf32>
    %15 = vector.shape_cast %14 : vector<1x8x256xf32> to vector<8x256xf32>
    %16 = vector.shape_cast %13 : vector<8x256xf32> to vector<1x8x256xf32>
    tpu.vector_store %arg6[%c0_12, %c0_13, %c0_14], %16 {strides = array<i32>} : memref<1x8x256xf32, #tpu.memory_space<vmem>>, vector<1x8x256xf32>,
    return
  }
  func.func @transform_0(%arg0: i32) -> (i32, i32, i32) {
    %c0_i32 = arith.constant 0 : i32
    %c0_i32_0 = arith.constant 0 : i32
    %c0_i32_1 = arith.constant 0 : i32
    return %arg0, %c0_i32, %c0_i32_0 : i32, i32, i32
  }
  func.func @transform_1(%arg0: i32) -> (i32, i32) {
    %c0_i32 = arith.constant 0 : i32
    %c0_i32_0 = arith.constant 0 : i32
    %c0_i32_1 = arith.constant 0 : i32
    return %c0_i32, %c0_i32_0 : i32, i32
  }
  func.func @transform_2(%arg0: i32) -> (i32, i32) {
    %c0_i32 = arith.constant 0 : i32
    %c0_i32_0 = arith.constant 0 : i32
    %c0_i32_1 = arith.constant 0 : i32
    return %c0_i32, %c0_i32_0 : i32, i32
  }
  func.func @transform_3(%arg0: i32) -> (i32, i32) {
    %c0_i32 = arith.constant 0 : i32
    %c0_i32_0 = arith.constant 0 : i32
    %c0_i32_1 = arith.constant 0 : i32
    return %c0_i32, %c0_i32_0 : i32, i32
  }
  func.func @transform_4(%arg0: i32) -> (i32, i32) {
    %c0_i32 = arith.constant 0 : i32
    %c0_i32_0 = arith.constant 0 : i32
    %c0_i32_1 = arith.constant 0 : i32
    return %c0_i32, %c0_i32_0 : i32, i32
  }
  func.func @transform_5(%arg0: i32) -> (i32, i32, i32) {
    %c0_i32 = arith.constant 0 : i32
    %c0_i32_0 = arith.constant 0 : i32
    %c0_i32_1 = arith.constant 0 : i32
    return %arg0, %c0_i32, %c0_i32_0 : i32, i32, i32
  }
}

</mosaic_0001>

<bundles_post_ra>
// kernel: tpu_custom_call.1
= control target key start
LH: loop header
LB: loop body
LE: loop exit
PB: predicated region body
PF: predicated region fallthrough
CT: control target
= control target key end

     0   :  { %10 = vsyncpa [#allocation3], 0  ;;  %s674_s0 = inlined_call_operand.vmem [shape: f32[2,36,256], index: 0, kind: input, shape index: {}]   ;;  %s675_s1 = inlined_call_operand.vmem [shape: f32[8,36], index: 1, kind: input, shape index: {}]   ;;  %s676_s2 = inlined_call_operand.vmem [shape: f32[8,1], index: 2, kind: input, shape index: {}]   ;;  %s677_s3 = inlined_call_operand.vmem [shape: f32[8,8], index: 3, kind: input, shape index: {}]   ;;  %s678_s4 = inlined_call_operand.vmem [shape: f32[8,1], index: 4, kind: input, shape index: {}]   ;;  %s679_s5 = inlined_call_operand.hbm [shape: f32[2,8,256], index: 5, kind: output, shape index: {}]  }
   0x1   :  { %12 = vsyncpa [#allocation3 + $0x1], 0  ;;  %s577_s18 = smov 0   ;;  %s579_s19 = smov 0  }
   0x2   :  { %s581_s20 = smov 0   ;;  %s583_s21 = smov 0  }
   0x3 LB: > { %s598_s22 = sadd.s32 4294967295, %s544_s21   ;;  %s422_s23 = sadd.s32 4294967294, %s544_s21   ;;  %s544_s21 = sphi %s583_s21, %s685_s21   ;;  %s540_s20 = sphi %s581_s20, %s684_s20   ;;  %s536_s19 = sphi %s579_s19, %s683_s19   ;;  %s532_s18 = sphi %s577_s18, %s682_s18  }
   0x4   : > { %s602_s24 = sadd.s32 1, %s544_s21   ;;  %s135_s25 = sadd.s32 1, %s540_s20 }
   0x5   : > { %s132_s26 = ssub.s32 %s544_s21, %s602_s24  ;;  %p145_p0 = scmp.ne.s32.totalorder %s540_s20, %s536_s19 }
   0x6   : > { %p133_p1 = scmp.eq.s32.totalorder %s132_s26, 0  ;;  %p146_p2 = scmp.eq.s32.totalorder %s598_s22, 1 }
   0x7   : > { %p151_p3 = scmp.ne.s32.totalorder %s536_s19, %s532_s18  ;;  %p152_p4 = scmp.eq.s32.totalorder %s422_s23, 1 }
   0x8   : > { %s613_s27 = scalar_select %p133_p1, %s540_s20, %s135_s25  }
   0x9   : > { %p615_p5 = por %p146_p2, %p145_p0  ;;  %p619_p6 = por %p152_p4, %p151_p3 }
   0xa   : > { %p425_p7 = scmp.ge.s32.totalorder %s544_s21, 1  ;;  %p190_p8 = scmp.lt.s32.totalorder %s544_s21, 3 }
   0xc   : > { %p191_p9 = pnand %p425_p7, %p190_p8 }
   0xd   : > { %p218_p10 = scmp.lt.s32.totalorder (!%p191_p9), %s598_s22, 1  ;;  %s215_s23 = sand.u32 (!%p191_p9), 1, %s536_s19  }
   0xe   : > { %194 = sbr.rel (%p191_p9) target bundleno = 303 (0x12f), region = 40  ;;  %s426_s25 = sshll.u32 (!%p191_p9), %s215_s23, 4 }
   0xf   : > { %s439_s26 = sshll.u32 (!%p191_p9), %s598_s22, 4  ;;  %s502_s15 = scalar_lea.hbm (!%p191_p9), %s679_s5, 32 }
  0x13   : > { %v234_v0 = vld [vmem:[%s676_s2] sm:$0xff]  ;;  %v546_v1 = vmov 0   ;;  %s219_s7 = scalar_select %p218_p10, %s598_s22, 1  ;;  %vm244_vm0 = vcmask 1043456   ;;  %vm240_vm1 = vcmask 293888   ;;  %vm300_vm2 = vcmask 64512  }
  0x14   : > { %481 = vset.pattern.permute.xlu0 %v546_v1  ;;  %v294_v6 = vld [vmem:[%s678_s4] sm:$0xff] }
  0x15   : > { %237 = vperm.xlu0 %481, %v234_v0   ;;  %s440_s8 = smul.u32 80, %s219_s7  ;;  %v233_v13 = vld [vmem:[%s675_s1] sm:$0xff]  ;;  %s358_s7 = scalar_lea.hbm %s679_s5, %s439_s26 }
  0x16   : > { %v293_v21 = vld [vmem:[%s677_s3] sm:$0xff]  ;;  %s362_s10 = sshll.u32 %s358_s7, 4  ;;  %s363_s10 = int_to_ptr.hbm [resolvable:$true] %s362_s10 }
  0x17   : > { %s222_s11 = scalar_lea.vmem %s674_s0, %s440_s8  ;;  %s217_s8 = scalar_lea.vmem [#allocation2], %s426_s25 }
  0x18   : > { %v231_v2 = vld [vmem:[%s222_s11 + $0x40] sm:$0xf]  ;;  %v232_v3 = vld [vmem:[%s222_s11 + $0x48] sm:$0xf]  ;;  %v229_v4 = vld [vmem:[%s222_s11 + $0x30] sm:$0xff]  ;;  %s360_s9 = sshll.u32 %s217_s8, 4  ;;  %s361_s9 = int_to_ptr.vmem [resolvable:$true] %s360_s9 }
  0x19   : > { %428 = vmatpush.msk.msra.mxu0 %vm244_vm0, %v231_v2  ;;  %430 = vmatpush.msk.msra.mxu1 %vm244_vm0, %v232_v3  ;;  %v230_v5 = vld [vmem:[%s222_s11 + $0x38] sm:$0xff]  ;;  %v227_v7 = vld [vmem:[%s222_s11 + $0x20] sm:$0xff]  ;;  %v228_v8 = vld [vmem:[%s222_s11 + $0x28] sm:$0xff]  ;;  %s496_s12 = sshra.s32 %s363_s10, 4  ;;  %s497_s12 = int_to_ptr.hbm [resolvable:$true] %s496_s12 }
  0x1a   : > { %v225_v9 = vld [vmem:[%s222_s11 + $0x10] sm:$0xff]  ;;  %v226_v10 = vld [vmem:[%s222_s11 + $0x18] sm:$0xff]  ;;  %v223_v11 = vld [vmem:[%s222_s11] sm:$0xff]  ;;  %s498_s22 = scalar_lea.hbm %s497_s12, 16  ;;  %p503_p0 = scmp.lt.s32.totalorder %s497_s12, %s679_s5 }
  0x1b   : > { %263 = vmatpush.msra.mxu0 %v229_v4  ;;  %283 = vmatpush.msra.mxu1 %v230_v5  ;;  %v224_v12 = vld [vmem:[%s222_s11 + $0x8] sm:$0xff]  ;;  %s347_s11 = scalar_lea.sflag [#allocation3], %s215_s23  ;;  %p499_p11 = scmp.ne.s32.totalorder %s497_s12, %s498_s22 }
  0x1c   : > { %p504_p1 = scmp.lt.s32.totalorder %s502_s15, %s498_s22 }
  0x1d   : > { %297 = vperm.xlu0 %481, %v294_v6   ;;  %264 = vmatpush.msra.mxu0 %v227_v7  ;;  %p500_p12 = pnand %p499_p11, %p615_p5 }
  0x1e   : > { %284 = vmatpush.msra.mxu1 %v228_v8  ;;  %p505_p2 = por %p504_p1, %p503_p0 }
  0x1f   : > { %265 = vmatpush.msra.mxu0 %v225_v9  ;;  %p501_p13 = pneg %p500_p12 }
  0x20   : > { %285 = vmatpush.msra.mxu1 %v226_v10 }
  0x21   : > { %266 = vmatpush.msra.mxu0 %v223_v11  ;;  %p506_p3 = pnand %p505_p2, %p501_p13 }
  0x22   : > { %286 = vmatpush.msra.mxu1 %v224_v12  ;;  %429 = vmatmul.msk.f32.vlgmr.msra.gmra.mxu0 %vm240_vm1, %v233_v13 }
  0x23   : > { %431 = vmatmul.msk.f32.vlgmr.msra.gmra.mxu1 %vm240_vm1, %v233_v13 }
  0x87   : > { %v238_v14 = vpop.permute.xlu0 %237 }
  0x8f   : > { %v298_v22 = vpop.permute.xlu0 %297 }
  0x9f   : > { %v268_v15 = vpop.f32.mrf.mxu0 }
  0xa0   : > { %v288_v16 = vpop.f32.mrf.mxu1  ;;  %v269_v17 = vadd.f32 %v268_v15, %v238_v14 }
  0xa1   : > { %v289_v18 = vadd.f32 %v288_v16, %v238_v14 }
  0xa2   : > { %v291_v19 = vmax.f32 %v269_v17, 0.0 }
  0xa3   : > { %v292_v20 = vmax.f32 %v289_v18, 0.0 }
  0xa4   : > { %319 = vmatpush.msra.mxu2 %v291_v19 }
  0xa5   : > { %339 = vmatpush.msra.mxu3 %v292_v20  ;;  %432 = vmatmul.msk.f32.vlgmr.msra.gmra.mxu2 %vm300_vm2, %v293_v21 }
  0xa6   : > { %433 = vmatmul.msk.f32.vlgmr.msra.gmra.mxu3 %vm300_vm2, %v293_v21 }
 0x128   : > { %v321_v23 = vpop.f32.mrf.mxu2 }
 0x129   : > { %v341_v24 = vpop.f32.mrf.mxu3  ;;  %v322_v25 = vadd.f32 %v321_v23, %v298_v22 }
 0x12a   : > { %v342_v26 = vadd.f32 %v341_v24, %v298_v22 }
 0x12b   : > { %344 = vst [vmem:[%s217_s8] sm:$0xff] %v322_v25 }
 0x12c   : > { %345 = vst [vmem:[%s217_s8 + $0x8] sm:$0xff] %v342_v26 }
 0x12d   : > { %509 = shalt.err (!%p506_p3)
}
 0x12e   : > { %441 = dma.vmem_to_hbm [thread:$0]  (%p615_p5), %s361_s9, 256, %s363_s10, %s347_s11  }
 0x12f PF: > { %p447_p4 = scmp.ge.s32.totalorder %s544_s21, 2  ;;  %s374_s23 = sand.u32 1, %s532_s18  }
 0x130   : > { %s375_s25 = scalar_lea.sflag [#allocation3], %s374_s23 }
 0x131   : > { %p444_p7 = pnand %p447_p4, %p619_p6 }
 0x133   : > { %p445_p8 = pneg %p444_p7 }
 0x135   : > { %527 = dma.done.wait (%p445_p8), %s375_s25, 256  }
 0x136   : > { %529 = vsyncadd (%p445_p8), %s375_s25, 4294967040  ;;  %p15_p9 = scmp.ge.s32.totalorder %s602_s24, 4   ;;  %s682_s18 = smov %s536_s19 }
 0x137   : > { %s683_s19 = smov %s540_s20  ;;  %s684_s20 = smov %s613_s27 }
 0x138   : > { %s685_s21 = smov %s602_s24  ;;  %17 = sbr.rel (!%p15_p9) target bundleno = 3 (0x3), region = 75 }
 0x13d   :  { %381 = vsyncpa [#allocation3], 1 }
 0x13e   :  { %383 = vsyncpa [#allocation3 + $0x1], 1 }

</bundles_post_ra>
